<compile_context>
chip_gen: v7x
topology: tpu7x:2x2x1
jax: 0.10.0
libtpu: 0.0.40
codegen_flags: <defaults>
</compile_context>

<pallas_src>
import functools
import numpy as np
import jax
import jax.numpy as jnp
from jax import lax
from jax.experimental import pallas as pl
from jax.experimental.pallas import tpu as pltpu


def _pick_tile(size, candidates):
    for c in candidates:
        if c <= size and size % c == 0:
            return c
    return size


def _pick_rows(H, W, Cin, Cout):
    """Rows of the image processed per grid step for 1x1 convs (divisor of H)."""
    best = 1
    for d in range(1, H + 1):
        if H % d:
            continue
        rows = d * W
        # input bf16 + f32 dot result + bf16 out, x2 for pipeline double-buffering
        step_bytes = rows * (Cin * 2 + Cout * 6) * 2
        if rows <= 2048 and step_bytes <= 6 * 1024 * 1024:
            best = d
    return best


# ------------------------- fused conv (+BN stats) kernel -------------------------

def _make_conv_kernel(spatial, kh, kw, TH, W, Wp, Cin, Cout):
    n_x = kh if spatial else 1

    def kernel(*refs):
        x_refs = refs[:n_x]
        w_ref = refs[n_x]
        o_ref, s_ref, q_ref = refs[n_x + 1:]

        if spatial:
            # implicit GEMM: one deep-K dot per vertical tap, accumulate in f32.
            out = None
            for dy in range(kh):
                row = x_refs[dy][0, 0]                                   # (Wp, Cin) bf16
                a_dy = jnp.concatenate(
                    [row[dx:dx + W, :] for dx in range(kw)], axis=-1)    # (W, kw*Cin)
                w_dy = w_ref[dy * kw * Cin:(dy + 1) * kw * Cin, :]       # (kw*Cin, Cout)
                part = jnp.dot(a_dy, w_dy, preferred_element_type=jnp.float32)
                out = part if out is None else out + part                # (W, Cout) f32
        else:
            a = x_refs[0][0].reshape(TH * W, Cin)                        # (TH*W, Cin)
            out = jnp.dot(a, w_ref[...], preferred_element_type=jnp.float32)

        # BN batch-statistics fused into the epilogue (resident accumulator blocks).
        @pl.when(pl.program_id(1) == 0)
        def _():
            s_ref[...] = jnp.zeros_like(s_ref)
            q_ref[...] = jnp.zeros_like(q_ref)
        s_ref[...] += jnp.sum(out, axis=0, keepdims=True).reshape(1, 1, Cout)
        q_ref[...] += jnp.sum(out * out, axis=0, keepdims=True).reshape(1, 1, Cout)

        o_ref[...] = out.reshape(o_ref.shape).astype(o_ref.dtype)

    return kernel


def conv2d_fused(x, w, out_dtype):
    """x: (N,H,W,Cin); w: (kh,kw,Cin,Cout).  Stride 1, 'same' padding, no bias.

    Returns (conv (N,H,W,Cout) out_dtype,
             per-image column sums (N,1,Cout) f32,
             per-image column sums of squares (N,1,Cout) f32)."""
    N, H, W, Cin = x.shape
    kh, kw, _, Cout = w.shape
    K = kh * kw * Cin
    spatial = (kh, kw) != (1, 1)

    xb = x.astype(jnp.bfloat16)
    w2d = w.reshape(K, Cout).astype(jnp.bfloat16)

    if spatial:
        ph, pw = (kh - 1) // 2, (kw - 1) // 2
        Wp = W + kw - 1
        xp = jnp.pad(xb, ((0, 0), (ph, ph), (pw, pw), (0, 0)))
        TH = 1
        grid = (N, H)
        # kh views of the SAME padded array, one padded row each, shifted by dy.
        in_specs = [pl.BlockSpec((1, 1, Wp, Cin),
                                 (lambda n, y, dy=dy: (n, y + dy, 0, 0)))
                    for dy in range(kh)]
        in_specs.append(pl.BlockSpec((K, Cout), lambda n, y: (0, 0)))     # resident weight
        args = [xp] * kh + [w2d]
    else:
        Wp = W
        TH = _pick_rows(H, W, Cin, Cout)
        grid = (N, H // TH)
        in_specs = [pl.BlockSpec((1, TH, W, Cin), lambda n, i: (n, i, 0, 0)),
                    pl.BlockSpec((K, Cout), lambda n, i: (0, 0))]         # resident weight
        args = [xb, w2d]

    kernel = _make_conv_kernel(spatial, kh, kw, TH, W, Wp, Cin, Cout)
    out_shape = (jax.ShapeDtypeStruct((N, H, W, Cout), out_dtype),
                 jax.ShapeDtypeStruct((N, 1, Cout), jnp.float32),
                 jax.ShapeDtypeStruct((N, 1, Cout), jnp.float32))
    out_specs = (pl.BlockSpec((1, TH, W, Cout), lambda n, i: (n, i, 0, 0)),
                 pl.BlockSpec((1, 1, Cout), lambda n, i: (n, 0, 0)),
                 pl.BlockSpec((1, 1, Cout), lambda n, i: (n, 0, 0)))

    return pl.pallas_call(
        kernel,
        out_shape=out_shape,
        grid=grid,
        in_specs=in_specs,
        out_specs=out_specs,
        compiler_params=pltpu.CompilerParams(
            dimension_semantics=("parallel", "arbitrary")),
    )(*args)


# ------------------------- normalize (+ReLU) kernel -------------------------

def _scale_shift_relu_kernel(x_ref, sc_ref, sh_ref, o_ref):
    y = jnp.maximum(x_ref[...].astype(jnp.float32) * sc_ref[...] + sh_ref[...], 0.0)
    o_ref[...] = y.astype(o_ref.dtype)


def _scale_shift_relu(x, scale, shift):
    """x: (M, C) bf16 conv output -> relu(x*scale + shift) in bf16, row-tiled."""
    M, C = x.shape
    ts = _pick_tile(M, (2048, 1024, 512, 256, 128, 64, 32, 16, 8))
    return pl.pallas_call(
        _scale_shift_relu_kernel,
        out_shape=jax.ShapeDtypeStruct((M, C), jnp.bfloat16),
        grid=(M // ts,),
        in_specs=[pl.BlockSpec((ts, C), lambda i: (i, 0)),
                  pl.BlockSpec((1, C), lambda i: (0, 0)),
                  pl.BlockSpec((1, C), lambda i: (0, 0))],
        out_specs=pl.BlockSpec((ts, C), lambda i: (i, 0)),
        compiler_params=pltpu.CompilerParams(dimension_semantics=("parallel",)),
    )(x, scale, shift)


# ------------------------- conv (+BN+ReLU) block -------------------------

@functools.partial(jax.jit, static_argnames=("bn_relu",))
def conv2d_block(x, w, b, *, bn_relu=True):
    """Conv2d (stride 1, 'same').  If bn_relu: training-mode BatchNorm2d (batch stats,
    biased var, eps=1e-5, identity affine) + ReLU -> bf16; the conv bias is exactly
    cancelled by the mean subtraction and is skipped.  Else conv + bias -> f32."""
    N, H, W, _ = x.shape
    Cout = w.shape[-1]
    if bn_relu:
        y, s, q = conv2d_fused(x, w, jnp.bfloat16)
        M = N * H * W
        s = jnp.sum(s, axis=(0, 1))
        q = jnp.sum(q, axis=(0, 1))
        mean = s / M
        var = jnp.maximum(q / M - mean * mean, 0.0)
        inv = lax.rsqrt(var + 1e-5)
        scale = inv.reshape(1, Cout)
        shift = (-mean * inv).reshape(1, Cout)
        yn = _scale_shift_relu(y.reshape(M, Cout), scale, shift)
        return yn.reshape(N, H, W, Cout)
    else:
        y, _, _ = conv2d_fused(x, w, jnp.float32)
        return y + b.astype(jnp.float32).reshape(1, 1, 1, Cout)


# ------------------------- glue ops (plain JAX) -------------------------

def avg_pool2(x):                        # nn.AvgPool2d(2)
    N, H, W, C = x.shape
    return x.reshape(N, H // 2, 2, W // 2, 2, C).mean(axis=(2, 4)).astype(x.dtype)


def upsample_nearest2(x):                # nn.UpsamplingNearest2d(scale_factor=2)
    return jnp.repeat(jnp.repeat(x, 2, axis=1), 2, axis=2)


# ------------------------- deterministic parameter init -------------------------

class ParamGen:
    def __init__(self, seed=0):
        self.key = jax.random.PRNGKey(seed)
        self.n = 0

    def _next(self):
        k = jax.random.fold_in(self.key, self.n)
        self.n += 1
        return k

    def conv(self, k, cin, cout):
        w = jax.random.normal(self._next(), (k, k, cin, cout), jnp.float32)
        w = w * (1.0 / np.sqrt(k * k * cin))
        b = 0.01 * jax.random.normal(self._next(), (cout,), jnp.float32)
        return {"w": w, "b": b}


# ------------------------- inception -------------------------

def make_inception(pg, cin, config, csf=1):
    base = pg.conv(1, cin, config[0][0] // csf)
    w1 = [base["w"]]
    splits = [config[0][0] // csf]
    branches = []
    for (f, a, b_) in config[1:]:
        p1 = pg.conv(1, cin, a // csf)
        p2 = pg.conv(f, a // csf, b_ // csf)
        w1.append(p1["w"])
        splits.append(a // csf)
        branches.append(p2)
    # All 1x1 convs sharing the block input (base conv + each branch's first conv)
    # are fused into one matmul; per-channel BN+ReLU afterwards keeps this exact.
    w1 = jnp.concatenate(w1, axis=-1)
    return {"w1": w1, "splits": tuple(splits), "branches": branches}


def inception_fwd(p, x):
    h = conv2d_block(x, p["w1"], None, bn_relu=True)       # fused 1x1s + BN + ReLU
    outs = [h[..., :p["splits"][0]]]
    off = p["splits"][0]
    for sp, br in zip(p["splits"][1:], p["branches"]):
        hi = h[..., off:off + sp]
        off += sp
        outs.append(conv2d_block(hi, br["w"], br["b"], bn_relu=True))
    return jnp.concatenate(outs, axis=-1)


CFG_256_A = [[64], [3, 32, 64], [5, 32, 64], [7, 32, 64]]
CFG_256_B = [[64], [3, 64, 64], [7, 64, 64], [11, 64, 64]]
CFG_256_I = [[32], [3, 32, 32], [5, 32, 32], [7, 32, 32]]
CFG_128_C = [[32], [3, 32, 32], [5, 32, 32], [7, 32, 32]]
CFG_128_D = [[64], [3, 32, 64], [5, 32, 64], [7, 32, 64]]
CFG_128_E = [[32], [3, 64, 32], [7, 64, 32], [11, 64, 32]]
CFG_128_F = [[32], [3, 64, 32], [5, 64, 32], [7, 64, 32]]
CFG_128_G = [[16], [3, 32, 16], [7, 32, 16], [11, 32, 16]]
CFG_128_H = [[16], [3, 64, 16], [7, 64, 16], [11, 64, 16]]


# ------------------------- Channels1..4 -------------------------

def make_channels1(pg, csf):
    return {"b0": [make_inception(pg, 256, CFG_256_A, csf) for _ in range(2)],
            "b1": [make_inception(pg, 256, CFG_256_A, csf) for _ in range(3)]}


def channels1_fwd(p, x):
    y0 = x
    for ip in p["b0"]:
        y0 = inception_fwd(ip, y0)
    y1 = avg_pool2(x)
    for ip in p["b1"]:
        y1 = inception_fwd(ip, y1)
    return y0 + upsample_nearest2(y1)


def make_channels2(pg, csf):
    return {"b0": [make_inception(pg, 256, CFG_256_A, csf),
                   make_inception(pg, 256, CFG_256_B, csf)],
            "b1_pre": [make_inception(pg, 256, CFG_256_A, csf),
                       make_inception(pg, 256, CFG_256_A, csf)],
            "b1_ch1": make_channels1(pg, csf),
            "b1_post": [make_inception(pg, 256, CFG_256_A, csf),
                        make_inception(pg, 256, CFG_256_B, csf)]}


def channels2_fwd(p, x):
    y0 = x
    for ip in p["b0"]:
        y0 = inception_fwd(ip, y0)
    y1 = avg_pool2(x)
    for ip in p["b1_pre"]:
        y1 = inception_fwd(ip, y1)
    y1 = channels1_fwd(p["b1_ch1"], y1)
    for ip in p["b1_post"]:
        y1 = inception_fwd(ip, y1)
    return y0 + upsample_nearest2(y1)


def make_channels3(pg, csf):
    return {"b0_pre": [make_inception(pg, 128, CFG_128_C, csf),
                       make_inception(pg, 128, CFG_128_D, csf)],
            "b0_ch2": make_channels2(pg, csf),
            "b0_post": [make_inception(pg, 256, CFG_256_A, csf),
                        make_inception(pg, 256, CFG_256_I, csf)],
            "b1": [make_inception(pg, 128, CFG_128_C, csf),
                   make_inception(pg, 128, CFG_128_E, csf)]}


def channels3_fwd(p, x):
    y0 = avg_pool2(x)
    for ip in p["b0_pre"]:
        y0 = inception_fwd(ip, y0)
    y0 = channels2_fwd(p["b0_ch2"], y0)
    for ip in p["b0_post"]:
        y0 = inception_fwd(ip, y0)
    y0 = upsample_nearest2(y0)
    y1 = x
    for ip in p["b1"]:
        y1 = inception_fwd(ip, y1)
    return y0 + y1


def make_channels4(pg, csf):
    return {"b0_pre": [make_inception(pg, 128, CFG_128_C, csf),
                       make_inception(pg, 128, CFG_128_C, csf)],
            "b0_ch3": make_channels3(pg, csf),
            "b0_post": [make_inception(pg, 128, CFG_128_F, csf),
                        make_inception(pg, 128, CFG_128_G, csf)],
            "b1": [make_inception(pg, 128, CFG_128_H, csf)]}


def channels4_fwd(p, x):
    y0 = avg_pool2(x)
    for ip in p["b0_pre"]:
        y0 = inception_fwd(ip, y0)
    y0 = channels3_fwd(p["b0_ch3"], y0)
    for ip in p["b0_post"]:
        y0 = inception_fwd(ip, y0)
    y0 = upsample_nearest2(y0)
    y1 = x
    for ip in p["b1"]:
        y1 = inception_fwd(ip, y1)
    return y0 + y1


# ------------------------- Model -------------------------

def make_model(pg, csf=1):
    return {"conv0": pg.conv(7, 3, 128 // csf),
            "ch4": make_channels4(pg, csf),
            "conv_out": pg.conv(3, 64 // csf, 1)}


def model_fwd(params, x_nchw):
    # torch.cat([x], dim=1) is the identity
    x = jnp.transpose(x_nchw, (0, 2, 3, 1)).astype(jnp.float32)      # NCHW -> NHWC
    x = conv2d_block(x, params["conv0"]["w"], params["conv0"]["b"],
                     bn_relu=True)                                    # Conv7x7+BN+ReLU
    x = channels4_fwd(params["ch4"], x)                               # Channels4
    x = conv2d_block(x, params["conv_out"]["w"], params["conv_out"]["b"],
                     bn_relu=False)                                   # Conv3x3 -> 1 ch
    # nn.Sigmoid() is constructed but NOT applied by Model.forward
    return jnp.transpose(x.astype(jnp.float32), (0, 3, 1, 2))         # NHWC -> NCHW


if __name__ == "__main__":
    # quick correctness check of the implicit-GEMM conv kernel against lax.conv
    xc = jax.random.normal(jax.random.PRNGKey(1), (1, 5, 6, 7), jnp.float32)
    wc = jax.random.normal(jax.random.PRNGKey(2), (3, 3, 7, 4), jnp.float32) / np.sqrt(63)
    ours, _, _ = conv2d_fused(xc, wc, jnp.float32)
    ref = lax.conv_general_dilated(xc, wc, (1, 1), "SAME",
                                   dimension_numbers=("NHWC", "HWIO", "NHWC"))
    assert float(jnp.max(jnp.abs(ours - ref))) < 0.08

    wc1 = jax.random.normal(jax.random.PRNGKey(3), (1, 1, 7, 9), jnp.float32) / np.sqrt(7)
    ours1, _, _ = conv2d_fused(xc, wc1, jnp.float32)
    ref1 = lax.conv_general_dilated(xc, wc1, (1, 1), "SAME",
                                    dimension_numbers=("NHWC", "HWIO", "NHWC"))
    assert float(jnp.max(jnp.abs(ours1 - ref1))) < 0.08

    key = jax.random.PRNGKey(0)
    x = jax.random.normal(key, (2, 3, 16, 16), jnp.float32)   # NCHW, like PyTorch
    pg = ParamGen(seed=0)
    params = make_model(pg, csf=1)
    out = model_fwd(params, x)
    out = jax.block_until_ready(out)
    assert out.shape == (2, 1, 16, 16), out.shape
    assert bool(jnp.all(jnp.isfinite(out)))
    print("KERNEL_OK")
</pallas_src>

<mosaic_0001>
module attributes {stable_mosaic.version = 11 : i64} {
  func.func @kernel(%arg0: i32, %arg1: i32, %arg2: memref<1x1x8x7xbf16, #tpu.memory_space<vmem>>, %arg3: memref<1x1x8x7xbf16, #tpu.memory_space<vmem>>, %arg4: memref<1x1x8x7xbf16, #tpu.memory_space<vmem>>, %arg5: memref<63x4xbf16, #tpu.memory_space<vmem>>, %arg6: memref<1x1x6x4xf32, #tpu.memory_space<vmem>>, %arg7: memref<1x1x4xf32, #tpu.memory_space<vmem>>, %arg8: memref<1x1x4xf32, #tpu.memory_space<vmem>>) attributes {dimension_semantics = [#tpu.dimension_semantics<parallel>, #tpu.dimension_semantics<arbitrary>], iteration_bounds = array<i64: 1, 5>, scalar_prefetch = 0 : i64, scratch_operands = 0 : i64, tpu.core_type = #tpu.core_type<tc>, window_params = [{transform_indices = @transform_0, window_bounds = array<i64: 1, 1, 8, 7>}, {transform_indices = @transform_1, window_bounds = array<i64: 1, 1, 8, 7>}, {transform_indices = @transform_2, window_bounds = array<i64: 1, 1, 8, 7>}, {pipeline_mode = #tpu.pipeline_mode<synchronous>, transform_indices = @transform_3, window_bounds = array<i64: 63, 4>}, {transform_indices = @transform_4, window_bounds = array<i64: 1, 1, 6, 4>}, {transform_indices = @transform_5, window_bounds = array<i64: 1, 1, 4>}, {transform_indices = @transform_6, window_bounds = array<i64: 1, 1, 4>}]} {
    %c0 = arith.constant 0 : index
    %c0_0 = arith.constant 0 : index
    %c0_1 = arith.constant 0 : index
    %c0_2 = arith.constant 0 : index
    %0 = vector.load %arg2[%c0, %c0_0, %c0_1, %c0_2] : memref<1x1x8x7xbf16, #tpu.memory_space<vmem>>, vector<1x1x8x7xbf16>
    %1 = vector.shape_cast %0 : vector<1x1x8x7xbf16> to vector<8x7xbf16>
    %2 = vector.extract_strided_slice %1 {offsets = [0, 0], sizes = [6, 7], strides = [1, 1]} : vector<8x7xbf16> to vector<6x7xbf16>
    %3 = vector.extract_strided_slice %1 {offsets = [1, 0], sizes = [6, 7], strides = [1, 1]} : vector<8x7xbf16> to vector<6x7xbf16>
    %4 = vector.extract_strided_slice %1 {offsets = [2, 0], sizes = [6, 7], strides = [1, 1]} : vector<8x7xbf16> to vector<6x7xbf16>
    %5 = tpu.concatenate %2, %3, %4 in 1 : vector<6x7xbf16>, vector<6x7xbf16>, vector<6x7xbf16> -> vector<6x21xbf16>
    %c0_3 = arith.constant 0 : index
    %c0_4 = arith.constant 0 : index
    %6 = vector.load %arg5[%c0_3, %c0_4] : memref<63x4xbf16, #tpu.memory_space<vmem>>, vector<21x4xbf16>
    %cst = arith.constant dense<0.000000e+00> : vector<6x4xf32>
    %7 = tpu.matmul %5, %6, %cst {dimension_numbers = #tpu.dot_dimension_numbers<[1], [0], [0], [1], [0, 0, 1, 1], [], []>} : vector<6x21xbf16>, vector<21x4xbf16>, vector<6x4xf32> -> vector<6x4xf32>
    %c0_5 = arith.constant 0 : index
    %c0_6 = arith.constant 0 : index
    %c0_7 = arith.constant 0 : index
    %c0_8 = arith.constant 0 : index
    %8 = vector.load %arg3[%c0_5, %c0_6, %c0_7, %c0_8] : memref<1x1x8x7xbf16, #tpu.memory_space<vmem>>, vector<1x1x8x7xbf16>
    %9 = vector.shape_cast %8 : vector<1x1x8x7xbf16> to vector<8x7xbf16>
    %10 = vector.extract_strided_slice %9 {offsets = [0, 0], sizes = [6, 7], strides = [1, 1]} : vector<8x7xbf16> to vector<6x7xbf16>
    %11 = vector.extract_strided_slice %9 {offsets = [1, 0], sizes = [6, 7], strides = [1, 1]} : vector<8x7xbf16> to vector<6x7xbf16>
    %12 = vector.extract_strided_slice %9 {offsets = [2, 0], sizes = [6, 7], strides = [1, 1]} : vector<8x7xbf16> to vector<6x7xbf16>
    %13 = tpu.concatenate %10, %11, %12 in 1 : vector<6x7xbf16>, vector<6x7xbf16>, vector<6x7xbf16> -> vector<6x21xbf16>
    %c21 = arith.constant 21 : index
    %c0_9 = arith.constant 0 : index
    %14 = vector.load %arg5[%c21, %c0_9] : memref<63x4xbf16, #tpu.memory_space<vmem>>, vector<21x4xbf16>
    %cst_10 = arith.constant dense<0.000000e+00> : vector<6x4xf32>
    %15 = tpu.matmul %13, %14, %cst_10 {dimension_numbers = #tpu.dot_dimension_numbers<[1], [0], [0], [1], [0, 0, 1, 1], [], []>} : vector<6x21xbf16>, vector<21x4xbf16>, vector<6x4xf32> -> vector<6x4xf32>
    %16 = arith.addf %7, %15 : vector<6x4xf32>
    %c0_11 = arith.constant 0 : index
    %c0_12 = arith.constant 0 : index
    %c0_13 = arith.constant 0 : index
    %c0_14 = arith.constant 0 : index
    %17 = vector.load %arg4[%c0_11, %c0_12, %c0_13, %c0_14] : memref<1x1x8x7xbf16, #tpu.memory_space<vmem>>, vector<1x1x8x7xbf16>
    %18 = vector.shape_cast %17 : vector<1x1x8x7xbf16> to vector<8x7xbf16>
    %19 = vector.extract_strided_slice %18 {offsets = [0, 0], sizes = [6, 7], strides = [1, 1]} : vector<8x7xbf16> to vector<6x7xbf16>
    %20 = vector.extract_strided_slice %18 {offsets = [1, 0], sizes = [6, 7], strides = [1, 1]} : vector<8x7xbf16> to vector<6x7xbf16>
    %21 = vector.extract_strided_slice %18 {offsets = [2, 0], sizes = [6, 7], strides = [1, 1]} : vector<8x7xbf16> to vector<6x7xbf16>
    %22 = tpu.concatenate %19, %20, %21 in 1 : vector<6x7xbf16>, vector<6x7xbf16>, vector<6x7xbf16> -> vector<6x21xbf16>
    %c42 = arith.constant 42 : index
    %c0_15 = arith.constant 0 : index
    %23 = vector.load %arg5[%c42, %c0_15] : memref<63x4xbf16, #tpu.memory_space<vmem>>, vector<21x4xbf16>
    %cst_16 = arith.constant dense<0.000000e+00> : vector<6x4xf32>
    %24 = tpu.matmul %22, %23, %cst_16 {dimension_numbers = #tpu.dot_dimension_numbers<[1], [0], [0], [1], [0, 0, 1, 1], [], []>} : vector<6x21xbf16>, vector<21x4xbf16>, vector<6x4xf32> -> vector<6x4xf32>
    %25 = arith.addf %16, %24 : vector<6x4xf32>
    %c0_i32 = arith.constant 0 : i32
    %26 = arith.cmpi eq, %arg1, %c0_i32 : i32
    %27 = arith.extui %26 : i1 to i32
    %c0_i32_17 = arith.constant 0 : i32
    %28 = arith.cmpi ne, %27, %c0_i32_17 : i32
    scf.if %28 {
      %cst_36 = arith.constant 0.000000e+00 : f32
      %44 = vector.broadcast %cst_36 : f32 to vector<1x1x4xf32>
      %c0_37 = arith.constant 0 : index
      %c0_38 = arith.constant 0 : index
      %c0_39 = arith.constant 0 : index
      %45 = vector.load %arg7[%c0_37, %c0_38, %c0_39] : memref<1x1x4xf32, #tpu.memory_space<vmem>>, vector<1x1x4xf32>
      tpu.vector_store %arg7[%c0_37, %c0_38, %c0_39], %44 {strides = array<i32>} : memref<1x1x4xf32, #tpu.memory_space<vmem>>, vector<1x1x4xf32>,
      %cst_40 = arith.constant 0.000000e+00 : f32
      %46 = vector.broadcast %cst_40 : f32 to vector<1x1x4xf32>
      %c0_41 = arith.constant 0 : index
      %c0_42 = arith.constant 0 : index
      %c0_43 = arith.constant 0 : index
      %47 = vector.load %arg8[%c0_41, %c0_42, %c0_43] : memref<1x1x4xf32, #tpu.memory_space<vmem>>, vector<1x1x4xf32>
      tpu.vector_store %arg8[%c0_41, %c0_42, %c0_43], %46 {strides = array<i32>} : memref<1x1x4xf32, #tpu.memory_space<vmem>>, vector<1x1x4xf32>,
    } else {
    }
    %c0_18 = arith.constant 0 : index
    %c0_19 = arith.constant 0 : index
    %c0_20 = arith.constant 0 : index
    %29 = vector.load %arg7[%c0_18, %c0_19, %c0_20] : memref<1x1x4xf32, #tpu.memory_space<vmem>>, vector<1x1x4xf32>
    %cst_21 = arith.constant dense<0.000000e+00> : vector<4xf32>
    %30 = vector.multi_reduction <add>, %25, %cst_21 [0] : vector<6x4xf32> to vector<4xf32>
    %31 = vector.shape_cast %30 : vector<4xf32> to vector<1x4xf32>
    %32 = vector.shape_cast %31 : vector<1x4xf32> to vector<1x1x4xf32>
    %33 = arith.addf %29, %32 : vector<1x1x4xf32>
    %c0_22 = arith.constant 0 : index
    %c0_23 = arith.constant 0 : index
    %c0_24 = arith.constant 0 : index
    %34 = vector.load %arg7[%c0_22, %c0_23, %c0_24] : memref<1x1x4xf32, #tpu.memory_space<vmem>>, vector<1x1x4xf32>
    tpu.vector_store %arg7[%c0_22, %c0_23, %c0_24], %33 {strides = array<i32>} : memref<1x1x4xf32, #tpu.memory_space<vmem>>, vector<1x1x4xf32>,
    %c0_25 = arith.constant 0 : index
    %c0_26 = arith.constant 0 : index
    %c0_27 = arith.constant 0 : index
    %35 = vector.load %arg8[%c0_25, %c0_26, %c0_27] : memref<1x1x4xf32, #tpu.memory_space<vmem>>, vector<1x1x4xf32>
    %36 = arith.mulf %25, %25 : vector<6x4xf32>
    %cst_28 = arith.constant dense<0.000000e+00> : vector<4xf32>
    %37 = vector.multi_reduction <add>, %36, %cst_28 [0] : vector<6x4xf32> to vector<4xf32>
    %38 = vector.shape_cast %37 : vector<4xf32> to vector<1x4xf32>
    %39 = vector.shape_cast %38 : vector<1x4xf32> to vector<1x1x4xf32>
    %40 = arith.addf %35, %39 : vector<1x1x4xf32>
    %c0_29 = arith.constant 0 : index
    %c0_30 = arith.constant 0 : index
    %c0_31 = arith.constant 0 : index
    %41 = vector.load %arg8[%c0_29, %c0_30, %c0_31] : memref<1x1x4xf32, #tpu.memory_space<vmem>>, vector<1x1x4xf32>
    tpu.vector_store %arg8[%c0_29, %c0_30, %c0_31], %40 {strides = array<i32>} : memref<1x1x4xf32, #tpu.memory_space<vmem>>, vector<1x1x4xf32>,
    %42 = vector.shape_cast %25 : vector<6x4xf32> to vector<1x1x6x4xf32>
    %c0_32 = arith.constant 0 : index
    %c0_33 = arith.constant 0 : index
    %c0_34 = arith.constant 0 : index
    %c0_35 = arith.constant 0 : index
    %43 = vector.load %arg6[%c0_32, %c0_33, %c0_34, %c0_35] : memref<1x1x6x4xf32, #tpu.memory_space<vmem>>, vector<1x1x6x4xf32>
    tpu.vector_store %arg6[%c0_32, %c0_33, %c0_34, %c0_35], %42 {strides = array<i32>} : memref<1x1x6x4xf32, #tpu.memory_space<vmem>>, vector<1x1x6x4xf32>,
    return
  }
  func.func @transform_0(%arg0: i32, %arg1: i32) -> (i32, i32, i32, i32) {
    %c0_i32 = arith.constant 0 : i32
    %0 = arith.addi %arg1, %c0_i32 : i32
    %c0_i32_0 = arith.constant 0 : i32
    %c0_i32_1 = arith.constant 0 : i32
    %c0_i32_2 = arith.constant 0 : i32
    return %arg0, %0, %c0_i32_0, %c0_i32_1 : i32, i32, i32, i32
  }
  func.func @transform_1(%arg0: i32, %arg1: i32) -> (i32, i32, i32, i32) {
    %c1_i32 = arith.constant 1 : i32
    %0 = arith.addi %arg1, %c1_i32 : i32
    %c0_i32 = arith.constant 0 : i32
    %c0_i32_0 = arith.constant 0 : i32
    %c0_i32_1 = arith.constant 0 : i32
    return %arg0, %0, %c0_i32, %c0_i32_0 : i32, i32, i32, i32
  }
  func.func @transform_2(%arg0: i32, %arg1: i32) -> (i32, i32, i32, i32) {
    %c2_i32 = arith.constant 2 : i32
    %0 = arith.addi %arg1, %c2_i32 : i32
    %c0_i32 = arith.constant 0 : i32
    %c0_i32_0 = arith.constant 0 : i32
    %c0_i32_1 = arith.constant 0 : i32
    return %arg0, %0, %c0_i32, %c0_i32_0 : i32, i32, i32, i32
  }
  func.func @transform_3(%arg0: i32, %arg1: i32) -> (i32, i32) {
    %c0_i32 = arith.constant 0 : i32
    %c0_i32_0 = arith.constant 0 : i32
    %c0_i32_1 = arith.constant 0 : i32
    return %c0_i32, %c0_i32_0 : i32, i32
  }
  func.func @transform_4(%arg0: i32, %arg1: i32) -> (i32, i32, i32, i32) {
    %c0_i32 = arith.constant 0 : i32
    %c0_i32_0 = arith.constant 0 : i32
    %c0_i32_1 = arith.constant 0 : i32
    return %arg0, %arg1, %c0_i32, %c0_i32_0 : i32, i32, i32, i32
  }
  func.func @transform_5(%arg0: i32, %arg1: i32) -> (i32, i32, i32) {
    %c0_i32 = arith.constant 0 : i32
    %c0_i32_0 = arith.constant 0 : i32
    %c0_i32_1 = arith.constant 0 : i32
    return %arg0, %c0_i32, %c0_i32_0 : i32, i32, i32
  }
  func.func @transform_6(%arg0: i32, %arg1: i32) -> (i32, i32, i32) {
    %c0_i32 = arith.constant 0 : i32
    %c0_i32_0 = arith.constant 0 : i32
    %c0_i32_1 = arith.constant 0 : i32
    return %arg0, %c0_i32, %c0_i32_0 : i32, i32, i32
  }
}

</mosaic_0001>

<bundles_post_ra>
// kernel: tpu_custom_call.1
= control target key start
LH: loop header
LB: loop body
LE: loop exit
PB: predicated region body
PF: predicated region fallthrough
CT: control target
= control target key end

     0   :  { %s1660_s0 = inlined_call_operand.vmem [shape: bf16[1,7,8,7], index: 0, kind: input, shape index: {}]   ;;  %s1661_s1 = inlined_call_operand.hbm [shape: bf16[1,7,8,7], index: 1, kind: input, shape index: {}]   ;;  %s1662_s2 = inlined_call_operand.hbm [shape: bf16[1,7,8,7], index: 2, kind: input, shape index: {}]   ;;  %s1663_s3 = inlined_call_operand.vmem [shape: bf16[63,4], index: 3, kind: input, shape index: {}]   ;;  %s1664_s4 = inlined_call_operand.vmem [shape: f32[1,5,6,4], index: 4, kind: output, shape index: {0}]   ;;  %s1665_s5 = inlined_call_operand.hbm [shape: f32[1,1,4], index: 5, kind: output, shape index: {1}]   ;;  %s1666_s6 = inlined_call_operand.hbm [shape: f32[1,1,4], index: 6, kind: output, shape index: {2}]  }
   0x1   :  { %1674 = sst [smem:[#allocation14_spill]] %s1665_s5 }
   0x2   :  { %1675 = sst [smem:[#allocation15_spill]] %s1666_s6 }
   0x3   :  { %12 = vsyncpa [#allocation3], 0 }
   0x4   :  { %14 = vsyncpa [#allocation3 + $0x1], 0 }
   0x5   :  { %15 = vsyncpa [#allocation6], 0 }
   0x6   :  { %17 = vsyncpa [#allocation6 + $0x1], 0 }
   0x7   :  { %18 = vsyncpa [#allocation4], 0 }
   0x8   :  { %19 = vsyncpa [#allocation9], 0  ;;  %s1299_s21 = smov 0   ;;  %s1301_s22 = smov 0  }
   0x9   :  { %s1303_s23 = smov 0   ;;  %s1305_s24 = smov 0  }
   0xa   :  { %s1307_s25 = smov 0   ;;  %s1309_s26 = smov 0  }
   0xb   :  { %s1311_s27 = smov 0   ;;  %s1313_s28 = smov 0  }
   0xc   :  { %s1315_s29 = smov 0  }
   0xd LB: > { %s1667_s30 = sadd.s32 4294967295, %s1252_s29   ;;  %s34_s7 = sadd.s32 1, %s1248_s28  ;;  %s1252_s29 = sphi %s1315_s29, %s25_s29   ;;  %s1248_s28 = sphi %s1313_s28, %s1701_s28   ;;  %s1244_s27 = sphi %s1311_s27, %s1700_s27   ;;  %s1240_s26 = sphi %s1309_s26, %s1699_s26   ;;  %s1236_s25 = sphi %s1307_s25, %s1698_s25   ;;  %s1232_s24 = sphi %s1305_s24, %s1697_s24   ;;  %s1228_s23 = sphi %s1303_s23, %s1696_s23   ;;  %s1224_s22 = sphi %s1301_s22, %s1695_s22   ;;  %s1220_s21 = sphi %s1299_s21, %s1694_s21  }
   0xe   : > { %p35_p0 = scmp.ge.s32.totalorder %s34_s7, 5  ;;  %s76_s8 = sadd.s32 1, %s1240_s26 }
   0xf   : > { %p83_p1 = scmp.ne.s32.totalorder %s1240_s26, %s1236_s25  ;;  %p1671_p2 = scmp.eq.s32.totalorder %s1252_s29, 0 }
  0x10   : > { %s1348_s9 = scalar_select %p35_p0, 0, %s34_s7  }
  0x11   : > { %p1352_p3 = por %p1671_p2, %p83_p1  ;;  %p89_p4 = scmp.ne.s32.totalorder %s1236_s25, %s1232_s24 }
  0x12   : > { %s70_s11 = sadd.s32 1, %s1348_s9  ;;  %p1360_p5 = scmp.eq.s32.totalorder %s1667_s30, 0 }
  0x13   : > { %s72_s13 = ssub.s32 %s34_s7, %s70_s11  ;;  %s99_s14 = sadd.s32 2, %s1248_s28 }
  0x14   : > { %p74_p6 = scmp.eq.s32.totalorder %s72_s13, 0  ;;  %p1367_p7 = por %p1360_p5, %p89_p4 }
  0x15   : > { %s100_s16 = sadd.s32 2, %s1348_s9  ;;  %p1670_p8 = scmp.lt.s32.totalorder %s1252_s29, 5 }
  0x16   : > { %s1678_s15 = scalar_select %p1367_p7, 1, 0 }
  0x17   : > { %s1373_s17 = scalar_select %p74_p6, %s1240_s26, %s76_s8  }
  0x18   : > { %s1375_s18 = ssub.s32 %s99_s14, %s100_s16  ;;  %s258_s19 = sand.u32 1, %s1240_s26  }
  0x19   : > { %s873_s20 = sshll.u32 %s258_s19, 2  ;;  %s874_s24 = sshll.u32 %s1248_s28, 6 }
  0x1a   : > { %s760_s13 = scalar_lea.hbm %s1661_s1, %s874_s24  ;;  %s262_s30 = scalar_lea.vmem [#allocation2], %s873_s20 }
  0x1b   : > { %s272_s6 = sshll.u32 %s262_s30, 4  ;;  %s1386_s5 = scalar_lea.hbm %s760_s13, 64  ;;  %s1388_s6 = int_to_ptr.vmem [resolvable:$true] %s272_s6 }
  0x1c   : > { %p1394_p10 = pnand %p1670_p8, %p1352_p3  ;;  %s259_s14 = scalar_lea.sflag [#allocation3], %s258_s19 }
  0x1d   : > { %s1082_s16 = scalar_lea.hbm %s760_s13, 128  ;;  %s1057_s20 = scalar_lea.hbm %s1661_s1, 448 }
  0x1e   : > { %p1053_p13 = scmp.ne.s32.totalorder %s1386_s5, %s1082_s16  ;;  %p1054_p0 = pneg %p1394_p10 }
  0x1f   : > { %p1058_p3 = scmp.lt.u32.totalorder %s1386_s5, %s1661_s1  ;;  %p1059_p6 = scmp.lt.u32.totalorder %s1057_s20, %s1082_s16 }
  0x20   : > { %p1055_p1 = pnand %p1054_p0, %p1053_p13  ;;  %p1061_p2 = scmp.lt.u32.totalorder %s1082_s16, %s1386_s5 }
  0x21   : > { %p1060_p8 = por %p1059_p6, %p1058_p3 }
  0x22   : > { %p1056_p4 = pneg %p1055_p1 }
  0x23   : > { %p1062_p9 = por %p1061_p2, %p1060_p8 }
  0x25   : > { %p1063_p11 = pnand %p1062_p9, %p1056_p4 }
  0x27   : > { %1066 = shalt.err (!%p1063_p11)
}
  0x28   : > { %s1067_s19 = scalar_lea.vmem %s1388_s6, 64  ;;  %s1254_s13 = smov [#allocation2]  }
  0x29   : > { %p1068_p13 = scmp.ne.s32.totalorder %s1388_s6, %s1067_s19  ;;  %s1072_s30 = sshll.u32 %s1254_s13, 4  ;;  %s1073_s30 = int_to_ptr.vmem [resolvable:$false] %s1072_s30 }
  0x2a   : > { %s1074_s10 = scalar_lea.vmem %s1073_s30, 128  ;;  %p1075_p7 = scmp.lt.s32.totalorder %s1388_s6, %s1073_s30 }
  0x2b   : > { %p1070_p1 = pnand %p1068_p13, %p1054_p0  ;;  %p1076_p3 = scmp.lt.s32.totalorder %s1074_s10, %s1067_s19 }
  0x2d   : > { %p1071_p12 = pneg %p1070_p1  ;;  %p1077_p6 = por %p1076_p3, %p1075_p7 }
  0x2f   : > { %p1078_p2 = pnand %p1077_p6, %p1071_p12 }
  0x31   : > { %1081 = shalt.err (!%p1078_p2)
}
  0x32   : > { %954 = dma.hbm_to_vmem [thread:$0]  (!%p1394_p10), %s1386_s5, 64, %s1388_s6, %s259_s14  }
  0x33   : > { %p1680_p7 = scmp.lt.s32.totalorder %s1252_s29, 6  ;;  %p1681_p8 = scmp.ge.s32.totalorder %s1252_s29, 1 }
  0x34   : > { %s106_s16 = sadd.s32 1, %s1228_s23  ;;  %p1683_p11 = scmp.eq.s32.totalorder %s1375_s18, 0 }
  0x35   : > { %p1428_p9 = pnand %p1681_p8, %p1680_p7  ;;  %p113_p12 = scmp.ne.s32.totalorder %s1228_s23, %s1224_s22 }
  0x36   : > { %s1436_s20 = scalar_select %p1683_p11, %s1228_s23, %s106_s16  }
  0x37   : > { %p119_p0 = scmp.ne.s32.totalorder %s1224_s22, %s1220_s21  ;;  %s279_s7 = sand.u32 1, %s1228_s23  }
  0x38   : > { %s768_s13 = scalar_lea.hbm %s1662_s2, %s874_s24  ;;  %p1684_p4 = scmp.eq.s32.totalorder %s1252_s29, 0 }
  0x39   : > { %p1452_p13 = por %p119_p0, %p1360_p5  ;;  %s875_s6 = sshll.u32 %s279_s7, 2 }
  0x3a   : > { %p115_p10 = por %p113_p12, %p1684_p4  ;;  %s1456_s14 = scalar_lea.hbm %s768_s13, 128 }
  0x3b   : > { %s1685_s5 = scalar_select %p1452_p13, 1, 0 }
  0x3c   : > { %s283_s21 = scalar_lea.vmem [#allocation5], %s875_s6  ;;  %p1686_p1 = scmp.lt.s32.totalorder %s1252_s29, 5 }
  0x3d   : > { %s293_s18 = sshll.u32 %s283_s21, 4  ;;  %s280_s12 = scalar_lea.sflag [#allocation6], %s279_s7  ;;  %s1464_s18 = int_to_ptr.vmem [resolvable:$true] %s293_s18 }
  0x3e   : > { %p1460_p3 = pnand %p1686_p1, %p115_p10  ;;  %s1113_s24 = scalar_lea.hbm %s768_s13, 192 }
  0x3f   : > { %p1084_p5 = scmp.ne.s32.totalorder %s1456_s14, %s1113_s24  ;;  %s1088_s11 = scalar_lea.hbm %s1662_s2, 448 }
  0x40   : > { %p1085_p6 = pneg %p1460_p3  ;;  %p1089_p8 = scmp.lt.u32.totalorder %s1456_s14, %s1662_s2 }
  0x41   : > { %p1090_p11 = scmp.lt.u32.totalorder %s1088_s11, %s1113_s24  ;;  %p1092_p0 = scmp.lt.u32.totalorder %s1113_s24, %s1456_s14 }
  0x42   : > { %p1086_p2 = pnand %p1085_p6, %p1084_p5 }
  0x43   : > { %p1091_p12 = por %p1090_p11, %p1089_p8 }
  0x44   : > { %p1087_p7 = pneg %p1086_p2 }
  0x45   : > { %p1093_p4 = por %p1092_p0, %p1091_p12 }
  0x47   : > { %p1094_p10 = pnand %p1093_p4, %p1087_p7 }
  0x49   : > { %1097 = shalt.err (!%p1094_p10)
}
  0x4a   : > { %s1098_s7 = scalar_lea.vmem %s1464_s18, 64  ;;  %s1255_s13 = smov [#allocation5]  }
  0x4b   : > { %p1099_p1 = scmp.ne.s32.totalorder %s1464_s18, %s1098_s7  ;;  %s1103_s21 = sshll.u32 %s1255_s13, 4  ;;  %s1104_s21 = int_to_ptr.vmem [resolvable:$false] %s1103_s21 }
  0x4c   : > { %s1105_s10 = scalar_lea.vmem %s1104_s21, 128  ;;  %p1106_p13 = scmp.lt.s32.totalorder %s1464_s18, %s1104_s21 }
  0x4d   : > { %p1101_p5 = pnand %p1099_p1, %p1085_p6  ;;  %p1107_p8 = scmp.lt.s32.totalorder %s1105_s10, %s1098_s7 }
  0x4f   : > { %p1102_p2 = pneg %p1101_p5  ;;  %p1108_p11 = por %p1107_p8, %p1106_p13 }
  0x51   : > { %p1109_p12 = pnand %p1108_p11, %p1102_p2 }
  0x53   : > { %1112 = shalt.err (!%p1109_p12)
}
  0x54   : > { %957 = dma.hbm_to_vmem [thread:$0]  (!%p1460_p3), %s1456_s14, 64, %s1464_s18, %s280_s12  }
  0x55   : > { %302 = sbr.rel (%p1428_p9) target bundleno = 526 (0x20e), region = 36  ;;  %s304_s24 = sand.u32 (!%p1428_p9), 1, %s1236_s25  }
  0x56   : > { %s878_s16 = sshll.u32 (!%p1428_p9), %s304_s24, 2  ;;  %s305_s11 = scalar_lea.sflag (!%p1428_p9), [#allocation3], %s304_s24 }
  0x57   : > { %s308_s19 = scalar_lea.vmem (!%p1428_p9), [#allocation2], %s878_s16  ;;  %p1688_p6 = scmp.ne.s32.totalorder (!%p1428_p9), %s1678_s15, 0 }
  0x5c   : > { %1203 = dma.done.wait (%p1688_p6), %s305_s11, 64  }
  0x5d   : > { %1205 = vsyncadd (%p1688_p6), %s305_s11, 4294967232  ;;  %s313_s30 = sand.u32 1, %s1224_s22   ;;  %p1689_p13 = scmp.ne.s32.totalorder %s1685_s5, 0 }
  0x5e   : > { %s879_s6 = sshll.u32 %s313_s30, 2  ;;  %s314_s7 = scalar_lea.sflag [#allocation6], %s313_s30 }
  0x5f   : > { %s317_s14 = scalar_lea.vmem [#allocation5], %s879_s6 }
  0x60   : > { %1207 = dma.done.wait (%p1689_p13), %s314_s7, 64  }
  0x61   : > { %1209 = vsyncadd (%p1689_p13), %s314_s7, 4294967232  ;;  %p364_p9 = scmp.lt.s32.totalorder %s1244_s27, 6  ;;  %v1256_v0 = vmov 0.0   ;;  %p374_p3 = scmp.lt.s32.totalorder %s1244_s27, 4  ;;  %vm464_vm0 = vcmask 1041408   ;;  %vm465_vm1 = vcmask 1042432  }
  0x62   : > { %918 = vmatprep.subr.bf16.mxu0 %v1256_v0  ;;  %910 = vmatprep.subr.bf16.mxu1 %v1256_v0  ;;  %v1257_v1 = vmov 65535   ;;  %v1513_v4 = vld [vmem:[%s308_s19] sm:$0xf]  ;;  %v1515_v5 = vld [vmem:[%s317_s14] sm:$0xf]  ;;  %vm1258_vm2 = vmmov 0  }
  0x63   : > { %s365_s15 = scalar_select %p364_p9, %s1244_s27, 6  ;;  %v466_v2 = vsel %vm464_vm0, 4294967295, %v1257_v1  ;;  %922 = vmatprep.mubr.msk.bf16.mxu0 %vm1258_vm2, %v1256_v0  ;;  %914 = vmatprep.mubr.msk.bf16.mxu1 %vm1258_vm2, %v1256_v0  ;;  %v883_v7 = vcombine.low %v1513_v4, %v1513_v4  ;;  %v890_v8 = vcombine.low %v1515_v5, %v1515_v5  ;;  %v1046_v9 = vld [vmem:[%s1663_s3] sm:$0xff]   ;;  %v1047_v11 = vld [vmem:[%s1663_s3 + $0x8] ss:$0 sps:$4 sm:$0x77]  }
  0x64   : > { %s375_s5 = scalar_select %p374_p3, %s1244_s27, 4  ;;  %v1535_v10 = vsel %vm465_vm1, %v466_v2, 0  ;;  %919 = vmatpush3.bf16.msra.mxu0 %v1046_v9  ;;  %v1048_v22 = vld [vmem:[%s1663_s3 + $0x8] sm:$0xfc]   ;;  %v1049_v23 = vld [vmem:[%s1663_s3 + $0x10] sm:$0x1f]  }
  0x65   : > { %s880_s8 = sshll.u32 %s365_s15, 2  ;;  %v412_v14 = vshrl.u32 %v883_v7, 16  ;;  %v414_v15 = vshll.u32 %v883_v7, 16  ;;  %v572_v16 = vshll.u32 %v890_v8, 16  ;;  %920 = vmatprep.subr.bf16.mxu0 %v1256_v0  ;;  %v570_v18 = vshrl.u32 %v890_v8, 16  ;;  %s1259_s18 = smov 7  }
  0x66   : > { %s369_s13 = scalar_lea.vmem %s1660_s0, %s880_s8  ;;  %s881_s24 = sshll.u32 %s375_s5, 3  ;;  %v523_v19 = vand.u32 %v1047_v11, %v1535_v10  ;;  %v444_v26 = vshrl.u32 %v1048_v22, 16  ;;  %v447_v27 = vshll.u32 %v1048_v22, 16  ;;  %v452_v29 = vshrl.u32 %v1049_v23, 16  ;;  %v1050_v42 = vld [vmem:[%s1663_s3 + $0x14] sm:$0xfe]  }
  0x67   : > { %v1511_v3 = vld [vmem:[%s369_s13] sm:$0xf]  ;;  %s1533_s19 = scalar_lea.vmem %s1664_s4, %s881_s24  ;;  %v416_v20 = vrot.slane %v414_v15, 1  ;;  %v574_v21 = vrot.slane %v572_v16, 1  ;;  %v455_v30 = vshll.u32 %v1049_v23, 16  ;;  %s1260_s12 = smov 14  }
  0x68   : > { %v882_v6 = vcombine.low %v1511_v3, %v1511_v3  ;;  %921 = vmatpush3.bf16.msra.mxu0 %v523_v19  ;;  %v446_v32 = vrot.slane %v444_v26, 2  ;;  %v449_v33 = vrot.slane %v447_v27, 3  ;;  %v454_v34 = vrot.slane %v452_v29, 2  ;;  %v1051_v43 = vld [vmem:[%s1663_s3 + $0x1c] ss:$0 sps:$4 sm:$0xff]   ;;  %p894_p7 = scmp.ne.s32.totalorder %s1244_s27, 0 }
  0x69   : > { %v417_v25 = vor.u32 %v416_v20, %v412_v14  ;;  %926 = vmatprep.subr.bf16.mxu0 %v1256_v0  ;;  %v575_v31 = vor.u32 %v574_v21, %v570_v18  ;;  %v457_v35 = vrot.slane %v455_v30, 3  ;;  %vm442_vm3 = vsmask.f32 5376 }
  0x6a   : > { %v386_v12 = vshrl.u32 %v882_v6, 16  ;;  %v388_v13 = vshll.u32 %v882_v6, 16  ;;  %v394_v28 = vrot.slane %v882_v6, 1  ;;  %v450_v36 = vor.u32 %v449_v33, %v446_v32 }
  0x6b   : > { %418 = vrot.lane.b32.xlu1 %v417_v25, %s1259_s18  ;;  %v420_v37 = vrot.slane %v883_v7, 1  ;;  %v458_v38 = vor.u32 %v457_v35, %v454_v34  ;;  %v578_v39 = vrot.slane %v890_v8, 1  ;;  %v598_v45 = vrot.slane %v1050_v42, 1 }
  0x6c   : > { %v390_v17 = vrot.slane %v388_v13, 1  ;;  %v599_v46 = vrot.slane %v1051_v43, 1  ;;  %vm397_vm4 = vcmask 56320   ;;  %vm597_vm5 = vcmask 1046528  }
  0x6d   : > { %v459_v40 = vsel %vm442_vm3, %v450_v36, %v458_v38  ;;  %v469_v41 = vand.u32 %v1535_v10, %v458_v38  ;;  %vm401_vm6 = vcmask 113664   ;;  %vm461_vm7 = vcmask 171008  }
  0x6e   : > { %v391_v24 = vor.u32 %v390_v17, %v386_v12  ;;  %911 = vmatpush3.bf16.msra.mxu1 %v459_v40  ;;  %v600_v50 = vsel %vm597_vm5, %v598_v45, %v599_v46  ;;  %v605_v53 = vand.u32 %v599_v46, %v1535_v10  ;;  %vm652_vm8 = vcmask (!%p894_p7), 24576  }
  0x6f   : > { %576 = vrot.lane.b32.xlu1 %v575_v31, %s1259_s18  ;;  %912 = vmatprep.subr.bf16.mxu1 %v1256_v0  ;;  %v1261_v6 = vmov (!%p894_p7), 0.0  }
  0x70   : > { %392 = vrot.lane.b32.xlu0 %v391_v24, %s1259_s18  ;;  %653 = vst.msk [vmem:[#allocation7] sm:$0x1] (!%p894_p7), %vm652_vm8, %v1261_v6  ;;  %654 = vst.msk [vmem:[#allocation8] sm:$0x1] (!%p894_p7), %vm652_vm8, %v1261_v6 }
  0x72   : > { %913 = vmatpush3.bf16.msra.mxu1 %v469_v41 }
  0x73   : > { %579 = vrot.lane.b32.xlu1 %v578_v39, %s1260_s12 }
  0x74   : > { %395 = vrot.lane.b32.xlu0 %v394_v28, %s1260_s12 }
  0x78   : > { %421 = vrot.lane.b32.xlu0 %v420_v37, %s1260_s12 }
  0xdd   : > { %v419_v47 = vpop.permute.xlu1 %418 }
  0xde   : > { %v425_v52 = vsel %vm397_vm4, %v1513_v4, %v419_v47 }
  0xe1   : > { %v577_v55 = vpop.permute.xlu1 %576 }
  0xe2   : > { %v393_v44 = vpop.permute.xlu0 %392  ;;  %v583_v57 = vsel %vm397_vm4, %v1515_v5, %v577_v55 }
  0xe3   : > { %v400_v48 = vsel %vm397_vm4, %v1511_v3, %v393_v44 }
  0xe5   : > { %v580_v58 = vpop.permute.xlu1 %579 }
  0xe6   : > { %v396_v49 = vpop.permute.xlu0 %395  ;;  %v585_v59 = vsel %vm401_vm6, %v583_v57, %v580_v58 }
  0xe7   : > { %v403_v51 = vsel %vm401_vm6, %v400_v48, %v396_v49 }
  0xe8   : > { %923 = vmatmul.mubr.msk.bf16.vlgmr.msra.gmra.mrb[0].mxu0 %vm461_vm7, %v403_v51 }
  0xe9   : > { %927 = vmatpush3.bf16.msra.mxu0 %v600_v50  ;;  %930 = vmatprep.mubr.msk.bf16.mxu0 %vm1258_vm2, %v1256_v0 }
  0xea   : > { %v422_v54 = vpop.permute.xlu0 %421  ;;  %928 = vmatprep.subr.bf16.mxu0 %v1256_v0 }
  0xeb   : > { %v427_v56 = vsel %vm401_vm6, %v425_v52, %v422_v54 }
  0xec   : > { %915 = vmatmul.mubr.msk.bf16.vlgmr.msra.gmra.mrb[0].mxu1 %vm461_vm7, %v427_v56 }
  0xed   : > { %929 = vmatpush3.bf16.msra.mxu0 %v605_v53 }
  0xf4   : > { %931 = vmatmul.mubr.msk.bf16.vlgmr.msra.gmra.mrb[0].mxu0 %vm461_vm7, %v585_v59 }
 0x1bf   : > { %v505_v60 = vpop.f32.mrb[0].mxu1 }
 0x1c0   : > { %v916_v61 = vpop.f32.mrb[1].mxu1 }
 0x1c1   : > { %v508_v62 = vpop.f32.mrb[2].mxu1 }
 0x1c2   : > { %v917_v63 = vpop.f32.mrb[3].mxu1 }
 0x1c4   : > { %651 = sbr.rel (%p894_p7) target bundleno = 459 (0x1cb), region = 48 }
 0x1c7   : > { %v641_v1 = vpop.f32.mrb[0].mxu0 }
 0x1c8   : > { %v934_v2 = vadd.f32 %v641_v1, %v505_v60  ;;  %v932_v0 = vpop.f32.mrb[1].mxu0 }
 0x1c9   : > { %v644_v3 = vpop.f32.mrb[2].mxu0 }
 0x1ca   : > { %v933_v4 = vpop.f32.mrb[3].mxu0 }
 0x1cb PF: > { %vm656_vm9 = vcmask 29696   ;;  %v668_v5 = vmul.f32 %v934_v2, %v934_v2  ;;  %v655_v18 = vld [vmem:[#allocation7] sm:$0x1]  ;;  %s1262_s27 = smov [#allocation7]   ;;  %v667_v21 = vld [vmem:[#allocation8] sm:$0x1] }
 0x1cc   : > { %v657_v7 = vsel %vm656_vm9, %v934_v2, 0.0  ;;  %678 = vst.msk [vmem:[%s1533_s19] sm:$0x3f] %vm656_vm9, %v934_v2  ;;  %s699_s24 = sshll.u32 %s1262_s27, 4  ;;  %s1263_s16 = smov [#allocation8]   ;;  %vm665_vm10 = vcmask 24576   ;;  %s700_s24 = int_to_ptr.vmem [resolvable:$true] %s699_s24 }
 0x1cd   : > { %v658_v8 = vrot.slane %v657_v7, 4  ;;  %v669_v9 = vsel %vm656_vm9, %v668_v5, 0.0  ;;  %s712_s11 = sshll.u32 %s1263_s16, 4  ;;  %s1690_s19 = sadd.s32 4294967295, %s1252_s29   ;;  %s1581_s11 = int_to_ptr.vmem [resolvable:$true] %s712_s11 }
 0x1ce   : > { %v670_v10 = vrot.slane %v669_v9, 4  ;;  %p1577_p0 = scmp.eq.s32.totalorder %s1690_s19, 4  ;;  %s1114_s6 = scalar_lea.vmem %s700_s24, 16 }
 0x1cf   : > { %v659_v11 = vadd.f32 %v658_v8, %v657_v7  ;;  %p1115_p4 = scmp.ne.s32.totalorder %s700_s24, %s1114_s6  ;;  %s1120_s7 = scalar_lea.vmem %s700_s24, 32 }
 0x1d0   : > { %v671_v12 = vadd.f32 %v670_v10, %v669_v9  ;;  %p1121_p5 = scmp.lt.s32.totalorder %s700_s24, %s700_s24  ;;  %p1122_p2 = scmp.lt.s32.totalorder %s1120_s7, %s1114_s6 }
 0x1d1   : > { %v660_v13 = vrot.slane %v659_v11, 2  ;;  %p1116_p10 = pnand %p1115_p4, %p1577_p0 }
 0x1d2   : > { %v672_v14 = vrot.slane %v671_v12, 2  ;;  %p1123_p8 = por %p1122_p2, %p1121_p5 }
 0x1d3   : > { %v661_v15 = vadd.f32 %v660_v13, %v659_v11  ;;  %p1117_p1 = pneg %p1116_p10 }
 0x1d4   : > { %v673_v16 = vadd.f32 %v672_v14, %v671_v12 }
 0x1d5   : > { %v662_v17 = vrot.slane %v661_v15, 1  ;;  %p1124_p11 = pnand %p1123_p8, %p1117_p1 }
 0x1d6   : > { %v674_v19 = vrot.slane %v673_v16, 1 }
 0x1d7   : > { %v663_v20 = vadd.f32 %v662_v17, %v661_v15 }
 0x1d8   : > { %v675_v22 = vadd.f32 %v674_v19, %v673_v16 }
 0x1d9   : > { %v664_v23 = vadd.f32 %v663_v20, %v655_v18 }
 0x1da   : > { %v676_v24 = vadd.f32 %v675_v22, %v667_v21 }
 0x1db   : > { %666 = vst.msk [vmem:[#allocation7] sm:$0x1] %vm665_vm10, %v664_v23 }
 0x1dc   : > { %677 = vst.msk [vmem:[#allocation8] sm:$0x1] %vm665_vm10, %v676_v24 }
 0x1dd   : > { %1127 = shalt.err (!%p1124_p11)
}
 0x1de   : > { %s1692_s8 = sld [smem:[#allocation14_spill]] }
 0x1e4   : > { %s1128_s18 = scalar_lea.hbm %s1692_s8, 16 }
 0x1e5   : > { %p1129_p12 = scmp.ne.s32.totalorder %s1692_s8, %s1128_s18  ;;  %p1134_p9 = scmp.lt.u32.totalorder %s1128_s18, %s1692_s8 }
 0x1e7   : > { %p1130_p6 = pnand %p1129_p12, %p1577_p0 }
 0x1e9   : > { %p1131_p13 = pneg %p1130_p6 }
 0x1eb   : > { %p1136_p3 = pnand %p1134_p9, %p1131_p13 }
 0x1ed   : > { %1139 = shalt.err (!%p1136_p3)
}
 0x1ee   : > { %944 = dma.vmem_to_hbm [thread:$0]  (%p1577_p0), %s700_s24, 16, %s1692_s8, [#allocation4]  }
 0x1ef   : > { %s1140_s16 = scalar_lea.vmem %s1581_s11, 16  ;;  %s1146_s19 = scalar_lea.vmem %s1581_s11, 32 }
 0x1f0   : > { %p1141_p7 = scmp.ne.s32.totalorder %s1581_s11, %s1140_s16  ;;  %p1147_p1 = scmp.lt.s32.totalorder %s1581_s11, %s1581_s11 }
 0x1f1   : > { %p1148_p5 = scmp.lt.s32.totalorder %s1146_s19, %s1140_s16 }
 0x1f2   : > { %p1142_p4 = pnand %p1141_p7, %p1577_p0 }
 0x1f3   : > { %p1149_p2 = por %p1148_p5, %p1147_p1 }
 0x1f4   : > { %p1143_p10 = pneg %p1142_p4 }
 0x1f6   : > { %p1150_p8 = pnand %p1149_p2, %p1143_p10 }
 0x1f8   : > { %1153 = shalt.err (!%p1150_p8)
}
 0x1f9   : > { %s1693_s14 = sld [smem:[#allocation15_spill]] }
 0x1ff   : > { %s1154_s15 = scalar_lea.hbm %s1693_s14, 16 }
 0x200   : > { %p1155_p11 = scmp.ne.s32.totalorder %s1693_s14, %s1154_s15  ;;  %p1160_p13 = scmp.lt.u32.totalorder %s1154_s15, %s1693_s14 }
 0x202   : > { %p1156_p12 = pnand %p1155_p11, %p1577_p0 }
 0x204   : > { %p1157_p6 = pneg %p1156_p12 }
 0x206   : > { %p1162_p9 = pnand %p1160_p13, %p1157_p6 }
 0x208   : > { %1165 = shalt.err (!%p1162_p9)
}
 0x209   : > { %946 = dma.vmem_to_hbm [thread:$0]  (%p1577_p0), %s1581_s11, 16, %s1693_s14, [#allocation9]  }
 0x20a   : > { %1211 = dma.done.wait (%p1577_p0), [#allocation4], 16  }
 0x20b   : > { %1213 = vsyncadd (%p1577_p0), [#allocation4], 4294967280 }
 0x20c   : > { %1215 = dma.done.wait (%p1577_p0), [#allocation9], 16  }
 0x20d   : > { %1217 = vsyncadd (%p1577_p0), [#allocation9], 4294967280 }
 0x20e PF: > { %s25_s29 = sadd.s32 1, %s1252_s29   ;;  %s1694_s21 = smov %s1224_s22 }
 0x20f   : > { %p22_p3 = scmp.ge.s32.totalorder %s25_s29, 7   ;;  %s1695_s22 = smov %s1228_s23 }
 0x210   : > { %s1696_s23 = smov %s1436_s20  ;;  %s1697_s24 = smov %s1236_s25 }
 0x211   : > { %s1698_s25 = smov %s1240_s26  ;;  %s1699_s26 = smov %s1373_s17 }
 0x212   : > { %s1700_s27 = smov %s1248_s28  ;;  %s1701_s28 = smov %s1348_s9 }
 0x213   :  { %24 = sbr.rel (!%p22_p3) target bundleno = 13 (0xd), region = 115 }
 0x21a   :  { %740 = vsyncpa [#allocation3], 1 }
 0x21b   :  { %742 = vsyncpa [#allocation3 + $0x1], 1 }
 0x21c   :  { %743 = vsyncpa [#allocation6], 1 }
 0x21d   :  { %745 = vsyncpa [#allocation6 + $0x1], 1 }
 0x21e   :  { %746 = vsyncpa [#allocation4], 1 }
 0x21f   :  { %748 = vsyncpa [#allocation4 + $0x1], 1 }
 0x220   :  { %749 = vsyncpa [#allocation9], 1 }

</bundles_post_ra>
